<compile_context>
chip_gen: v7x
topology: tpu7x:2x2x1
jax: 0.10.0
libtpu: 0.0.40
codegen_flags: <defaults>
</compile_context>

<pallas_src>
import jax
import jax.numpy as jnp
from jax.experimental import pallas as pl
from jax.experimental.pallas import tpu as pltpu


def _round_up(x, m):
    return ((x + m - 1) // m) * m


def _round_down(x, m):
    return (x // m) * m


def critic_kernel(xt_ref, w1t_ref, w2t_ref, w3t_ref, c_ref, q_ref):
    """One batch tile of TB columns.  Everything is feature-major: (features, batch)."""
    f1 = w1t_ref.shape[0]
    f2 = w2t_ref.shape[0]
    f3 = w3t_ref.shape[0]

    # Packed small params, read once: columns 0..4 = b1, b2, b3, wq, bq.
    c = c_ref[...]                        # (f_max, 5) f32
    b1 = c[0:f1, 0:1]
    b2 = c[0:f2, 1:2]
    b3 = c[0:f3, 2:3]
    wq = c[0:f3, 3:4]
    bq = c[0:1, 4:5]

    xt = xt_ref[...]                      # (K, TB)  bf16 or f32
    mxu_dtype = xt.dtype
    # Exact f32 matmuls when running the f32 path; default (single-pass) for bf16.
    prec = jax.lax.Precision.HIGHEST if mxu_dtype == jnp.float32 else None

    # fc1..fc3: MXU matmuls with f32 accumulation; bias + ReLU on the VPU in f32.
    h = jnp.dot(w1t_ref[...], xt,
                preferred_element_type=jnp.float32, precision=prec)
    h = jnp.maximum(h + b1, 0.0)          # (f1, TB) f32
    h = jnp.dot(w2t_ref[...], h.astype(mxu_dtype),
                preferred_element_type=jnp.float32, precision=prec)
    h = jnp.maximum(h + b2, 0.0)          # (f2, TB) f32
    h = jnp.dot(w3t_ref[...], h.astype(mxu_dtype),
                preferred_element_type=jnp.float32, precision=prec)
    h = jnp.maximum(h + b3, 0.0)          # (f3, TB) f32

    # q head (out_features == 1): VPU multiply + sublane reduction in f32.
    # Result is a lane-dense (1, TB) row -> full unmasked stores.
    q = jnp.sum(h * wq, axis=0, keepdims=True) + bq
    q_ref[...] = q.astype(q_ref.dtype)


def critic_forward(state, action, params, *, tb=2048, use_bf16=True):
    """state: (B, input_dims), action: (B, n_actions) -> q: (B, 1) float32."""
    w1, b1, w2, b2, w3, b3, wq, bq = params
    B, input_dims = state.shape
    n_actions = action.shape[1]
    K = input_dims + n_actions
    f1, f2, f3 = w1.shape[1], w2.shape[1], w3.shape[1]
    f_max = max(f1, f2, f3)

    # ---- batch tile selection (batch sits on the lane axis) -----------------
    # Multiple of 128 lanes; large default to amortize per-grid-step overhead.
    TB = max(128, _round_down(min(tb, _round_up(B, 128)), 128))
    b_min = _round_up(B, 128)
    # v7x has 2 TensorCores: keep >= 2 grid steps whenever there are at least
    # two tiles' worth of batch so the "parallel" axis can shard across them.
    # Harmless on single-TC v5e/v6e.
    if b_min >= 2 * 128 and TB >= b_min:
        TB = max(128, _round_down(b_min // 2, 128))
    B_pad = _round_up(B, TB)
    grid = (B_pad // TB,)

    # ---- feature-major inputs ------------------------------------------------
    # concat + pad + transpose are tiny XLA-side copies (~4*K bytes/row); in
    # exchange every in-kernel tensor and DMA is lane-dense along the batch.
    mxu_dtype = jnp.bfloat16 if use_bf16 else jnp.float32
    x = jnp.concatenate((state, action), axis=1)                       # (B, K)
    xt = jnp.pad(x, ((0, B_pad - B), (0, 0))).T.astype(mxu_dtype)      # (K, B_pad)
    w1t = w1.T.astype(mxu_dtype)                                       # (f1, K)
    w2t = w2.T.astype(mxu_dtype)                                       # (f2, f1)
    w3t = w3.T.astype(mxu_dtype)                                       # (f3, f2)

    # Pack the five small params into one array -> a single constant DMA stream.
    consts = jnp.zeros((f_max, 5), jnp.float32)
    consts = consts.at[:f1, 0].set(b1.reshape(f1))
    consts = consts.at[:f2, 1].set(b2.reshape(f2))
    consts = consts.at[:f3, 2].set(b3.reshape(f3))
    consts = consts.at[:f3, 3].set(wq.reshape(f3))
    consts = consts.at[0, 4].set(bq.reshape(()))

    itemsize = 2 if use_bf16 else 4
    flops = 2 * B_pad * (K * f1 + f1 * f2 + f2 * f3 + f3)
    bytes_accessed = (itemsize * (B_pad * K + K * f1 + f1 * f2 + f2 * f3)
                      + 4 * (f_max * 5 + B_pad))

    def const_spec(shape):
        return pl.BlockSpec(shape, lambda i: (0,) * len(shape))

    # TODO(synk): if fc dims are scaled up (512-2048 hidden), re-derive TB and
    # vmem_limit_bytes for v7x's 64 MiB VMEM (resident weights + double-buffered
    # (K, TB) tiles); at 32-wide layers VMEM is a non-issue on all generations.
    q_row = pl.pallas_call(
        critic_kernel,
        out_shape=jax.ShapeDtypeStruct((1, B_pad), jnp.float32),
        grid=grid,
        in_specs=[
            pl.BlockSpec((K, TB), lambda i: (0, i)),   # activation tile: batch on lanes
            const_spec(w1t.shape),                     # VMEM-resident weights
            const_spec(w2t.shape),
            const_spec(w3t.shape),
            const_spec(consts.shape),                  # packed biases / q head
        ],
        out_specs=pl.BlockSpec((1, TB), lambda i: (0, i)),
        compiler_params=pltpu.CompilerParams(
            dimension_semantics=("parallel",),         # shard batch tiles on v7x
            vmem_limit_bytes=32 * 1024 * 1024,
        ),
        cost_estimate=pl.CostEstimate(
            flops=flops, transcendentals=0, bytes_accessed=bytes_accessed),
    )(xt, w1t, w2t, w3t, consts)

    return q_row.reshape(B_pad, 1)[:B]


def init_params(key, input_dims, n_actions, fc1_dims, fc2_dims):
    """Deterministic init mimicking nn.Linear's U(-1/sqrt(fan_in), 1/sqrt(fan_in)).
    Weights stored transposed: (in_features, out_features)."""
    fc3_dims = fc2_dims
    dims = [
        (input_dims + n_actions, fc1_dims),
        (fc1_dims, fc2_dims),
        (fc2_dims, fc3_dims),
        (fc3_dims, 1),
    ]
    params = []
    for (fan_in, fan_out) in dims:
        key, kw, kb = jax.random.split(key, 3)
        bound = 1.0 / jnp.sqrt(jnp.float32(fan_in))
        w = jax.random.uniform(kw, (fan_in, fan_out), jnp.float32, -bound, bound)
        b = jax.random.uniform(kb, (1, fan_out), jnp.float32, -bound, bound)
        params += [w, b]
    return tuple(params)


def critic_reference(state, action, params):
    x = jnp.concatenate((state, action), axis=1)
    w1, b1, w2, b2, w3, b3, wq, bq = params
    h = jnp.maximum(x @ w1 + b1, 0.0)
    h = jnp.maximum(h @ w2 + b2, 0.0)
    h = jnp.maximum(h @ w3 + b3, 0.0)
    return h @ wq + bq


if __name__ == "__main__":
    input_dims = 8
    n_actions = 4
    fc1_dims = 32
    fc2_dims = 32

    key = jax.random.PRNGKey(0)
    key, kp = jax.random.split(key)
    params = init_params(kp, input_dims, n_actions, fc1_dims, fc2_dims)

    # Small-shape check, exact f32 path (B=2 -> one 128-lane tile).
    key, ks, ka = jax.random.split(key, 3)
    state = jax.random.normal(ks, (2, input_dims), jnp.float32)
    action = jax.random.normal(ka, (2, n_actions), jnp.float32)
    q_ref = critic_reference(state, action, params)
    q = jax.block_until_ready(critic_forward(state, action, params, use_bf16=False))
    assert q.shape == (2, 1)
    assert jnp.allclose(q, q_ref, atol=2e-3, rtol=2e-3)

    # Multi-tile check (B=200 -> TB=128, grid of 2, parallel axis), both dtypes.
    key, ks, ka = jax.random.split(key, 3)
    state = jax.random.normal(ks, (200, input_dims), jnp.float32)
    action = jax.random.normal(ka, (200, n_actions), jnp.float32)
    q_ref = critic_reference(state, action, params)
    q32 = jax.block_until_ready(critic_forward(state, action, params, use_bf16=False))
    qbf = jax.block_until_ready(critic_forward(state, action, params, use_bf16=True))
    assert q32.shape == (200, 1) and qbf.shape == (200, 1)
    assert jnp.allclose(q32, q_ref, atol=2e-3, rtol=2e-3)
    # bf16 MXU operands with f32 accumulation: looser tolerance vs. the f32 reference.
    assert jnp.allclose(qbf, q_ref, atol=5e-2, rtol=5e-2)

    print("KERNEL_OK")
</pallas_src>

<mosaic_0001>
module attributes {stable_mosaic.version = 11 : i64} {
  func.func @critic_kernel(%arg0: i32, %arg1: memref<12x128xf32, #tpu.memory_space<vmem>>, %arg2: memref<32x12xf32, #tpu.memory_space<vmem>>, %arg3: memref<32x32xf32, #tpu.memory_space<vmem>>, %arg4: memref<32x32xf32, #tpu.memory_space<vmem>>, %arg5: memref<32x5xf32, #tpu.memory_space<vmem>>, %arg6: memref<1x128xf32, #tpu.memory_space<vmem>>) attributes {dimension_semantics = [#tpu.dimension_semantics<parallel>], iteration_bounds = array<i64: 1>, scalar_prefetch = 0 : i64, scratch_operands = 0 : i64, tpu.core_type = #tpu.core_type<tc>, window_params = [{transform_indices = @transform_0, window_bounds = array<i64: 12, 128>}, {pipeline_mode = #tpu.pipeline_mode<synchronous>, transform_indices = @transform_1, window_bounds = array<i64: 32, 12>}, {pipeline_mode = #tpu.pipeline_mode<synchronous>, transform_indices = @transform_2, window_bounds = array<i64: 32, 32>}, {pipeline_mode = #tpu.pipeline_mode<synchronous>, transform_indices = @transform_3, window_bounds = array<i64: 32, 32>}, {pipeline_mode = #tpu.pipeline_mode<synchronous>, transform_indices = @transform_4, window_bounds = array<i64: 32, 5>}, {transform_indices = @transform_5, window_bounds = array<i64: 1, 128>}]} {
    %c0 = arith.constant 0 : index
    %c0_0 = arith.constant 0 : index
    %0 = vector.load %arg5[%c0, %c0_0] : memref<32x5xf32, #tpu.memory_space<vmem>>, vector<32x5xf32>
    %1 = vector.extract_strided_slice %0 {offsets = [0, 0], sizes = [32, 1], strides = [1, 1]} : vector<32x5xf32> to vector<32x1xf32>
    %2 = vector.extract_strided_slice %0 {offsets = [0, 1], sizes = [32, 1], strides = [1, 1]} : vector<32x5xf32> to vector<32x1xf32>
    %3 = vector.extract_strided_slice %0 {offsets = [0, 2], sizes = [32, 1], strides = [1, 1]} : vector<32x5xf32> to vector<32x1xf32>
    %4 = vector.extract_strided_slice %0 {offsets = [0, 3], sizes = [32, 1], strides = [1, 1]} : vector<32x5xf32> to vector<32x1xf32>
    %5 = vector.extract_strided_slice %0 {offsets = [0, 4], sizes = [1, 1], strides = [1, 1]} : vector<32x5xf32> to vector<1x1xf32>
    %c0_1 = arith.constant 0 : index
    %c0_2 = arith.constant 0 : index
    %6 = vector.load %arg1[%c0_1, %c0_2] : memref<12x128xf32, #tpu.memory_space<vmem>>, vector<12x128xf32>
    %c0_3 = arith.constant 0 : index
    %c0_4 = arith.constant 0 : index
    %7 = vector.load %arg2[%c0_3, %c0_4] : memref<32x12xf32, #tpu.memory_space<vmem>>, vector<32x12xf32>
    %cst = arith.constant dense<0.000000e+00> : vector<32x128xf32>
    %8 = tpu.matmul %7, %6, %cst {dimension_numbers = #tpu.dot_dimension_numbers<[1], [0], [0], [1], [0, 0, 1, 1], [], []>, precision = #tpu.contract_precision<fp32>} : vector<32x12xf32>, vector<12x128xf32>, vector<32x128xf32> -> vector<32x128xf32>
    %9 = vector.broadcast %1 : vector<32x1xf32> to vector<32x128xf32>
    %10 = arith.addf %8, %9 : vector<32x128xf32>
    %cst_5 = arith.constant 0.000000e+00 : f32
    %11 = vector.broadcast %cst_5 : f32 to vector<32x128xf32>
    %12 = arith.maximumf %10, %11 : vector<32x128xf32>
    %c0_6 = arith.constant 0 : index
    %c0_7 = arith.constant 0 : index
    %13 = vector.load %arg3[%c0_6, %c0_7] : memref<32x32xf32, #tpu.memory_space<vmem>>, vector<32x32xf32>
    %cst_8 = arith.constant dense<0.000000e+00> : vector<32x128xf32>
    %14 = tpu.matmul %13, %12, %cst_8 {dimension_numbers = #tpu.dot_dimension_numbers<[1], [0], [0], [1], [0, 0, 1, 1], [], []>, precision = #tpu.contract_precision<fp32>} : vector<32x32xf32>, vector<32x128xf32>, vector<32x128xf32> -> vector<32x128xf32>
    %15 = vector.broadcast %2 : vector<32x1xf32> to vector<32x128xf32>
    %16 = arith.addf %14, %15 : vector<32x128xf32>
    %cst_9 = arith.constant 0.000000e+00 : f32
    %17 = vector.broadcast %cst_9 : f32 to vector<32x128xf32>
    %18 = arith.maximumf %16, %17 : vector<32x128xf32>
    %c0_10 = arith.constant 0 : index
    %c0_11 = arith.constant 0 : index
    %19 = vector.load %arg4[%c0_10, %c0_11] : memref<32x32xf32, #tpu.memory_space<vmem>>, vector<32x32xf32>
    %cst_12 = arith.constant dense<0.000000e+00> : vector<32x128xf32>
    %20 = tpu.matmul %19, %18, %cst_12 {dimension_numbers = #tpu.dot_dimension_numbers<[1], [0], [0], [1], [0, 0, 1, 1], [], []>, precision = #tpu.contract_precision<fp32>} : vector<32x32xf32>, vector<32x128xf32>, vector<32x128xf32> -> vector<32x128xf32>
    %21 = vector.broadcast %3 : vector<32x1xf32> to vector<32x128xf32>
    %22 = arith.addf %20, %21 : vector<32x128xf32>
    %cst_13 = arith.constant 0.000000e+00 : f32
    %23 = vector.broadcast %cst_13 : f32 to vector<32x128xf32>
    %24 = arith.maximumf %22, %23 : vector<32x128xf32>
    %25 = vector.broadcast %4 : vector<32x1xf32> to vector<32x128xf32>
    %26 = arith.mulf %24, %25 : vector<32x128xf32>
    %cst_14 = arith.constant dense<0.000000e+00> : vector<128xf32>
    %27 = vector.multi_reduction <add>, %26, %cst_14 [0] : vector<32x128xf32> to vector<128xf32>
    %28 = vector.shape_cast %27 : vector<128xf32> to vector<1x128xf32>
    %29 = vector.broadcast %5 : vector<1x1xf32> to vector<1x128xf32>
    %30 = arith.addf %28, %29 : vector<1x128xf32>
    %c0_15 = arith.constant 0 : index
    %c0_16 = arith.constant 0 : index
    %31 = vector.load %arg6[%c0_15, %c0_16] : memref<1x128xf32, #tpu.memory_space<vmem>>, vector<1x128xf32>
    tpu.vector_store %arg6[%c0_15, %c0_16], %30 {strides = array<i32>} : memref<1x128xf32, #tpu.memory_space<vmem>>, vector<1x128xf32>,
    return
  }
  func.func @transform_0(%arg0: i32) -> (i32, i32) {
    %c0_i32 = arith.constant 0 : i32
    %c0_i32_0 = arith.constant 0 : i32
    return %c0_i32, %arg0 : i32, i32
  }
  func.func @transform_1(%arg0: i32) -> (i32, i32) {
    %c0_i32 = arith.constant 0 : i32
    %c0_i32_0 = arith.constant 0 : i32
    %c0_i32_1 = arith.constant 0 : i32
    return %c0_i32, %c0_i32_0 : i32, i32
  }
  func.func @transform_2(%arg0: i32) -> (i32, i32) {
    %c0_i32 = arith.constant 0 : i32
    %c0_i32_0 = arith.constant 0 : i32
    %c0_i32_1 = arith.constant 0 : i32
    return %c0_i32, %c0_i32_0 : i32, i32
  }
  func.func @transform_3(%arg0: i32) -> (i32, i32) {
    %c0_i32 = arith.constant 0 : i32
    %c0_i32_0 = arith.constant 0 : i32
    %c0_i32_1 = arith.constant 0 : i32
    return %c0_i32, %c0_i32_0 : i32, i32
  }
  func.func @transform_4(%arg0: i32) -> (i32, i32) {
    %c0_i32 = arith.constant 0 : i32
    %c0_i32_0 = arith.constant 0 : i32
    %c0_i32_1 = arith.constant 0 : i32
    return %c0_i32, %c0_i32_0 : i32, i32
  }
  func.func @transform_5(%arg0: i32) -> (i32, i32) {
    %c0_i32 = arith.constant 0 : i32
    %c0_i32_0 = arith.constant 0 : i32
    return %c0_i32, %arg0 : i32, i32
  }
}

</mosaic_0001>

<bundles_post_ra>
// kernel: tpu_custom_call.1
= control target key start
LH: loop header
LB: loop body
LE: loop exit
PB: predicated region body
PF: predicated region fallthrough
CT: control target
= control target key end

     0   :  { %vm64_vm0 = vcmask 1043456   ;;  %vm51_vm1 = vcmask 97280   ;;  %s2904_s0 = inlined_call_operand.vmem [shape: f32[12,128], index: 0, kind: input, shape index: {}]   ;;  %s2905_s1 = inlined_call_operand.vmem [shape: f32[32,12], index: 1, kind: input, shape index: {}]   ;;  %s2906_s2 = inlined_call_operand.vmem [shape: f32[32,32], index: 2, kind: input, shape index: {}]   ;;  %s2907_s3 = inlined_call_operand.vmem [shape: f32[32,32], index: 3, kind: input, shape index: {}]   ;;  %s2908_s4 = inlined_call_operand.vmem [shape: f32[32,5], index: 4, kind: input, shape index: {}]   ;;  %s2909_s5 = inlined_call_operand.hbm [shape: f32[1,128], index: 5, kind: output, shape index: {}]  }
   0x1   :  { %v25_v0 = vld [vmem:[%s2904_s0] sm:$0xff]  ;;  %v26_v1 = vld [vmem:[%s2904_s0 + $0x8] sm:$0xf]  ;;  %v29_v7 = vld [vmem:[%s2905_s1 + $0x10] sm:$0xff] }
   0x2   :  { %v27_v2 = vld [vmem:[%s2905_s1] sm:$0xff]  ;;  %v66_v3 = vsel %vm64_vm0, %v26_v1, 0  ;;  %v69_v4 = vand.u32 4294901760, %v25_v0  ;;  %v28_v6 = vld [vmem:[%s2905_s1 + $0x8] sm:$0xff]  ;;  %v30_v8 = vld [vmem:[%s2905_s1 + $0x18] sm:$0xff]  ;;  %v59_v12 = vsel %vm51_vm1, %v29_v7, 0 }
   0x3   :  { %v53_v5 = vsel %vm51_vm1, %v27_v2, 0  ;;  %v72_v9 = vand.u32 4294901760, %v66_v3  ;;  %v56_v11 = vsel %vm51_vm1, %v28_v6, 0  ;;  %v2660_v14 = vand.u32 4294901760, %v59_v12 }
   0x4   :  { %v2656_v10 = vand.u32 4294901760, %v53_v5  ;;  %v2658_v13 = vand.u32 4294901760, %v56_v11  ;;  %v177_v15 = vsub.f32 %v25_v0, %v69_v4  ;;  %v62_v16 = vsel %vm51_vm1, %v30_v8, 0 }
   0x5   :  { %v2370_v17 = vpack.c.bf16 %v72_v9, %v69_v4  ;;  %v184_v19 = vsub.f32 %v66_v3, %v72_v9  ;;  %v2665_v20 = vand.u32 4294901760, %v62_v16 }
   0x6   :  { %v2663_v18 = vsub.f32 %v53_v5, %v2656_v10 }
   0x7   :  { %10 = vsyncpa [#allocation3], 0  ;;  %v2668_v21 = vsub.f32 %v56_v11, %v2658_v13  ;;  %v2671_v22 = vsub.f32 %v59_v12, %v2660_v14  ;;  %v178_v23 = vand.u32 4294901760, %v177_v15  ;;  %2383 = vmatprep.subr.bf16.mxu0 %v2370_v17  ;;  %2371 = vmatprep.subr.bf16.mxu1 %v2370_v17  ;;  %v185_v25 = vand.u32 4294901760, %v184_v19  ;;  %v2678_v27 = vld [vmem:[%s2908_s4] sm:$0xff]  ;;  %v2689_v42 = vld [vmem:[%s2908_s4 + $0x10] sm:$0xff] }
   0x8   :  { %v137_v24 = vand.u32 4294901760, %v2663_v18  ;;  %v166_v26 = vsub.f32 %v62_v16, %v2665_v20  ;;  %2385 = vmatpush3.bf16.msra.mxu0 %v2370_v17  ;;  %2373 = vmatpush3.bf16.msra.mxu1 %v2370_v17  ;;  %v2602_v35 = vmov 0   ;;  %v2378_v46 = vpack.c.bf16 %v184_v19, %v177_v15  ;;  %v2695_v48 = vld [vmem:[%s2908_s4 + $0x8] sm:$0xff]  ;;  %v2702_v49 = vld [vmem:[%s2908_s4 + $0x18] sm:$0xff]  ;;  %v660_v50 = vld [vmem:[%s2906_s2] sm:$0xff] }
   0x9   :  { %v147_v28 = vand.u32 4294901760, %v2668_v21  ;;  %v157_v29 = vand.u32 4294901760, %v2671_v22  ;;  %v179_v30 = vsub.f32 %v177_v15, %v178_v23  ;;  %v186_v32 = vsub.f32 %v184_v19, %v185_v25  ;;  %2568 = vset.pattern.permute.xlu0 %v2602_v35  ;;  %2569 = vset.pattern.permute.xlu1 %v2602_v35  ;;  %v661_v58 = vld [vmem:[%s2906_s2 + $0x8] sm:$0xff]  ;;  %v662_v60 = vld [vmem:[%s2906_s2 + $0x10] sm:$0xff]  ;;  %v663_v2 = vld [vmem:[%s2906_s2 + $0x18] sm:$0xff] }
   0xa   :  { %2176 = vmatprep.mubr.f32.mxu0 %v137_v24  ;;  %v138_v31 = vsub.f32 %v2663_v18, %v137_v24  ;;  %v167_v33 = vand.u32 4294901760, %v166_v26  ;;  %v2386_v34 = vpack.c.bf16 %v185_v25, %v178_v23  ;;  %33 = vperm.xlu0 %2568, %v2678_v27   ;;  %vm680_vm2 = vcmask 261120  }
   0xb   :  { %v148_v36 = vsub.f32 %v2668_v21, %v147_v28  ;;  %v180_v37 = vand.u32 4294901760, %v179_v30  ;;  %v158_v38 = vsub.f32 %v2671_v22, %v157_v29  ;;  %2177 = vmatmul.mubr.f32.vlgmr.msra.gmra.mrb[0].mxu0 %v147_v28  ;;  %v187_v40 = vand.u32 4294901760, %v186_v32  ;;  %43 = vperm.xlu1 %2569, %v2689_v42  }
   0xc   :  { %v139_v39 = vand.u32 4294901760, %v138_v31  ;;  %2387 = vmatprep.subr.bf16.mxu0 %v2386_v34  ;;  %v168_v41 = vsub.f32 %v166_v26, %v167_v33  ;;  %2179 = vmatprep.mubr.f32.mxu0 %v157_v29  ;;  %v682_v51 = vsel %vm680_vm2, %v660_v50, 0  ;;  %v2603_v57 = vmov 1  }
   0xd   :  { %v149_v43 = vand.u32 4294901760, %v148_v36  ;;  %2389 = vmatpush3.bf16.msra.mxu0 %v2386_v34  ;;  %v159_v44 = vand.u32 4294901760, %v158_v38  ;;  %v2374_v45 = vpack.c.bf16 %v187_v40, %v180_v37  ;;  %v2723_v52 = vand.u32 4294901760, %v682_v51 }
   0xe   :  { %2146 = vmatprep.mubr.f32.mxu1 %v139_v39  ;;  %2391 = vmatprep.subr.bf16.mxu0 %v2370_v17  ;;  %v169_v47 = vand.u32 4294901760, %v168_v41  ;;  %v685_v61 = vsel %vm680_vm2, %v661_v58, 0  ;;  %v688_v1 = vsel %vm680_vm2, %v662_v60, 0 }
   0xf   :  { %2147 = vmatmul.mubr.f32.vlgmr.msra.gmra.mrb[0].mxu1 %v149_v43  ;;  %2375 = vmatprep.subr.bf16.mxu1 %v2374_v45  ;;  %v2726_v53 = vsub.f32 %v682_v51, %v2723_v52  ;;  %v2747_v3 = vand.u32 4294901760, %v685_v61  ;;  %v2749_v9 = vand.u32 4294901760, %v688_v1 }
  0x10   :  { %2180 = vmatmul.mubr.f32.gmra.mrb[2].mxu0 %v167_v33  ;;  %2377 = vmatpush3.bf16.msra.mxu1 %v2374_v45 }
  0x11   :  { %2149 = vmatprep.mubr.f32.mxu1 %v159_v44  ;;  %2186 = vmatprep.mubr.f32.mxu0 %v2656_v10  ;;  %v764_v54 = vand.u32 4294901760, %v2726_v53 }
  0x12   :  { %2379 = vmatprep.subr.bf16.mxu1 %v2378_v46  ;;  %38 = vperm.xlu0 %2568, %v2695_v48  }
  0x13   :  { %2150 = vmatmul.mubr.f32.gmra.mrb[2].mxu1 %v169_v47  ;;  %48 = vperm.xlu1 %2569, %v2702_v49   ;;  %v765_v55 = vsub.f32 %v2726_v53, %v764_v54 }
  0x14   :  { %2187 = vmatmul.mubr.f32.vlgmr.msra.gmra.mrb[0].mxu0 %v2658_v13  ;;  %2156 = vmatprep.mubr.f32.mxu1 %v2656_v10 }
  0x15   :  { %2189 = vmatprep.mubr.f32.mxu0 %v2660_v14  ;;  %2393 = vmatpush3.bf16.msra.mxu0 %v2370_v17  ;;  %v766_v56 = vand.u32 4294901760, %v765_v55 }
  0x16   :  { %2570 = vset.pattern.permute.xlu0 %v2603_v57 }
  0x17   :  { %2157 = vmatmul.mubr.f32.vlgmr.msra.gmra.mrb[0].mxu1 %v2658_v13  ;;  %2571 = vset.pattern.permute.xlu1 %v2603_v57 }
  0x18   :  { %2190 = vmatmul.mubr.f32.gmra.mrb[2].mxu0 %v2665_v20  ;;  %2381 = vmatpush3.bf16.msra.mxu1 %v2378_v46 }
  0x19   :  { %2159 = vmatprep.mubr.f32.mxu1 %v2660_v14  ;;  %2196 = vmatprep.mubr.f32.mxu0 %v2656_v10  ;;  %v691_v10 = vsel %vm680_vm2, %v663_v2, 0 }
  0x1a   :  { %669 = vperm.xlu1 %2571, %v2695_v48   ;;  %665 = vperm.xlu0 %2570, %v2678_v27  }
  0x1b   :  { %2160 = vmatmul.mubr.f32.gmra.mrb[2].mxu1 %v2665_v20 }
  0x1c   :  { %2197 = vmatmul.mubr.f32.vlgmr.msra.gmra.mrb[0].mxu0 %v2658_v13  ;;  %2166 = vmatprep.mubr.f32.mxu1 %v2663_v18  ;;  %v2755_v18 = vand.u32 4294901760, %v691_v10 }
  0x1d   :  { %2199 = vmatprep.mubr.f32.mxu0 %v2660_v14  ;;  %v2753_v14 = vsub.f32 %v685_v61, %v2747_v3 }
  0x1e   :  { %673 = vperm.xlu1 %2571, %v2689_v42   ;;  %677 = vperm.xlu0 %2570, %v2702_v49   ;;  %v2762_v31 = vsub.f32 %v691_v10, %v2755_v18 }
  0x1f   :  { %2167 = vmatmul.mubr.f32.vlgmr.msra.gmra.mrb[0].mxu1 %v2668_v21  ;;  %v774_v28 = vand.u32 4294901760, %v2753_v14 }
  0x20   :  { %2200 = vmatmul.mubr.f32.gmra.mrb[2].mxu0 %v2665_v20  ;;  %2169 = vmatprep.mubr.f32.mxu1 %v2671_v22  ;;  %v2758_v22 = vsub.f32 %v688_v1, %v2749_v9  ;;  %v794_v44 = vand.u32 4294901760, %v2762_v31 }
  0x21   :  { %v775_v39 = vsub.f32 %v2753_v14, %v774_v28 }
  0x22   :  { %v784_v34 = vand.u32 4294901760, %v2758_v22 }
  0x23   :  { %2170 = vmatmul.mubr.f32.gmra.mrb[2].mxu1 %v166_v26  ;;  %v776_v58 = vand.u32 4294901760, %v775_v39 }
  0x24   :  { %2210 = vmatprep.mubr.f32.mxu1 %v766_v56  ;;  %v785_v50 = vsub.f32 %v2758_v22, %v784_v34 }
  0x26   :  { %v786_v1 = vand.u32 4294901760, %v785_v50 }
  0x89   :  { %v34_v59 = vpop.permute.xlu0 %33 }
  0x8a   :  { %v44_v0 = vpop.permute.xlu1 %43 }
  0x91   :  { %v39_v4 = vpop.permute.xlu0 %38 }
  0x92   :  { %v49_v16 = vpop.permute.xlu1 %48 }
  0xef   :  { %v2198_v62 = vpop.f32.mrb[0].mxu0 }
  0xf0   :  { %v634_v63 = vpop.f32.mrb[1].mxu0 }
  0xf2   :  { %v2168_v5 = vpop.f32.mrb[0].mxu1 }
  0xf3   :  { %v2490_v6 = vadd.f32 %v2168_v5, %v39_v4  ;;  %v346_v7 = vpop.f32.mrb[1].mxu1  ;;  %v2201_v8 = vpop.f32.mrb[2].mxu0 }
  0xf4   :  { %v2492_v11 = vadd.f32 %v346_v7, %v34_v59  ;;  %v646_v12 = vpop.f32.mrb[3].mxu0 }
  0xf5   :  { %v2491_v13 = vadd.f32 %v2490_v6, %v2198_v62  ;;  %v795_v62 = vsub.f32 %v2762_v31, %v794_v44 }
  0xf6   :  { %v2493_v15 = vadd.f32 %v2492_v11, %v634_v63  ;;  %v2171_v17 = vpop.f32.mrb[2].mxu1 }
  0xf7   :  { %v657_v19 = vmax.f32 %v2491_v13, 0.0  ;;  %v2494_v20 = vadd.f32 %v2171_v17, %v49_v16  ;;  %v360_v21 = vpop.f32.mrb[3].mxu1  ;;  %v2606_v16 = vmov 4   ;;  %v1312_v17 = vld [vmem:[%s2907_s3 + $0x8] sm:$0xff] }
  0xf8   :  { %v656_v23 = vmax.f32 %v2493_v15, 0.0  ;;  %v2496_v24 = vadd.f32 %v360_v21, %v44_v0  ;;  %v2605_v15 = vmov 3  }
  0xf9   :  { %v697_v25 = vand.u32 4294901760, %v657_v19  ;;  %v2495_v26 = vadd.f32 %v2494_v20, %v2201_v8  ;;  %v796_v8 = vand.u32 4294901760, %v795_v62  ;;  %v666_v20 = vpop.permute.xlu0 %665 }
  0xfa   :  { %v694_v29 = vand.u32 4294901760, %v656_v23  ;;  %v2497_v30 = vadd.f32 %v2496_v24, %v646_v12 }
  0xfb   :  { %v811_v32 = vsub.f32 %v657_v19, %v697_v25  ;;  %v659_v33 = vmax.f32 %v2495_v26, 0.0 }
  0xfc   :  { %v2765_v35 = vpack.c.bf16 %v697_v25, %v694_v29  ;;  %v804_v36 = vsub.f32 %v656_v23, %v694_v29  ;;  %v658_v37 = vmax.f32 %v2497_v30, 0.0 }
  0xfd   :  { %v703_v38 = vand.u32 4294901760, %v659_v33  ;;  %v812_v40 = vand.u32 4294901760, %v811_v32 }
  0xfe   :  { %v700_v41 = vand.u32 4294901760, %v658_v37  ;;  %2395 = vmatprep.subr.bf16.mxu1 %v2765_v35  ;;  %v805_v43 = vand.u32 4294901760, %v804_v36  ;;  %v2410_v45 = vpack.c.bf16 %v811_v32, %v804_v36 }
  0xff   :  { %v825_v46 = vsub.f32 %v659_v33, %v703_v38  ;;  %2397 = vmatpush3.bf16.msra.mxu1 %v2765_v35  ;;  %v813_v47 = vsub.f32 %v811_v32, %v812_v40  ;;  %v678_v33 = vpop.permute.xlu0 %677 }
 0x100   :  { %v2398_v51 = vpack.c.bf16 %v703_v38, %v700_v41  ;;  %v818_v55 = vsub.f32 %v658_v37, %v700_v41  ;;  %v806_v56 = vsub.f32 %v804_v36, %v805_v43  ;;  %v2426_v57 = vpack.c.bf16 %v812_v40, %v805_v43 }
 0x101   :  { %v814_v59 = vand.u32 4294901760, %v813_v47  ;;  %v826_v60 = vand.u32 4294901760, %v825_v46 }
 0x102   :  { %2399 = vmatprep.subr.bf16.mxu1 %v2398_v51  ;;  %v807_v61 = vand.u32 4294901760, %v806_v56  ;;  %v819_v63 = vand.u32 4294901760, %v818_v55  ;;  %v2414_v0 = vpack.c.bf16 %v825_v46, %v818_v55 }
 0x103   :  { %2401 = vmatpush3.bf16.msra.mxu1 %v2398_v51  ;;  %v827_v2 = vsub.f32 %v825_v46, %v826_v60 }
 0x104   :  { %v2402_v4 = vpack.c.bf16 %v814_v59, %v807_v61  ;;  %v820_v5 = vsub.f32 %v818_v55, %v819_v63  ;;  %v2430_v6 = vpack.c.bf16 %v826_v60, %v819_v63 }
 0x105   :  { %v828_v7 = vand.u32 4294901760, %v827_v2 }
 0x106   :  { %2211 = vmatmul.mubr.f32.vlgmr.msra.gmra.mrb[4].mxu1 %v776_v58  ;;  %2403 = vmatprep.subr.bf16.mxu1 %v2402_v4  ;;  %v821_v10 = vand.u32 4294901760, %v820_v5 }
 0x107   :  { %2405 = vmatpush3.bf16.msra.mxu1 %v2402_v4  ;;  %2213 = vmatprep.mubr.f32.mxu1 %v786_v1 }
 0x108   :  { %v2406_v11 = vpack.c.bf16 %v828_v7, %v821_v10 }
 0x10a   :  { %2214 = vmatmul.mubr.f32.gmra.mrb[6].mxu1 %v796_v8  ;;  %2407 = vmatprep.subr.bf16.mxu1 %v2406_v11 }
 0x10b   :  { %2409 = vmatpush3.bf16.msra.mxu1 %v2406_v11  ;;  %2224 = vmatprep.mubr.f32.mxu1 %v2723_v52 }
 0x10c   :  { %2411 = vmatprep.subr.bf16.mxu1 %v2410_v45 }
 0x10e   :  { %2225 = vmatmul.mubr.f32.vlgmr.msra.gmra.mrb[4].mxu1 %v2747_v3 }
 0x10f   :  { %2413 = vmatpush3.bf16.msra.mxu1 %v2410_v45  ;;  %2227 = vmatprep.mubr.f32.mxu1 %v2749_v9 }
 0x110   :  { %2415 = vmatprep.subr.bf16.mxu1 %v2414_v0 }
 0x112   :  { %2228 = vmatmul.mubr.f32.gmra.mrb[6].mxu1 %v2755_v18 }
 0x113   :  { %2417 = vmatpush3.bf16.msra.mxu1 %v2414_v0  ;;  %2238 = vmatprep.mubr.f32.mxu1 %v2726_v53  ;;  %v1311_v53 = vld [vmem:[%s2907_s3] sm:$0xff] }
 0x114   :  { %2419 = vmatprep.subr.bf16.mxu1 %v2765_v35 }
 0x116   :  { %2239 = vmatmul.mubr.f32.vlgmr.msra.gmra.mrb[4].mxu1 %v2753_v14 }
 0x117   :  { %2421 = vmatpush3.bf16.msra.mxu1 %v2765_v35  ;;  %2241 = vmatprep.mubr.f32.mxu1 %v2758_v22 }
 0x118   :  { %2423 = vmatprep.subr.bf16.mxu1 %v2398_v51 }
 0x11a   :  { %2242 = vmatmul.mubr.f32.gmra.mrb[6].mxu1 %v2762_v31 }
 0x11b   :  { %2425 = vmatpush3.bf16.msra.mxu1 %v2398_v51  ;;  %2252 = vmatprep.mubr.f32.mxu1 %v764_v54  ;;  %v1332_v54 = vsel %vm680_vm2, %v1311_v53, 0 }
 0x11c   :  { %2427 = vmatprep.subr.bf16.mxu1 %v2426_v57  ;;  %v2807_v12 = vand.u32 4294901760, %v1332_v54 }
 0x11e   :  { %2253 = vmatmul.mubr.f32.vlgmr.msra.gmra.mrb[4].mxu1 %v774_v28  ;;  %v2810_v13 = vsub.f32 %v1332_v54, %v2807_v12 }
 0x11f   :  { %2429 = vmatpush3.bf16.msra.mxu1 %v2426_v57  ;;  %2255 = vmatprep.mubr.f32.mxu1 %v784_v34 }
 0x120   :  { %2431 = vmatprep.subr.bf16.mxu1 %v2430_v6  ;;  %v1414_v14 = vand.u32 4294901760, %v2810_v13 }
 0x122   :  { %2256 = vmatmul.mubr.f32.gmra.mrb[6].mxu1 %v794_v44 }
 0x123   :  { %2433 = vmatpush3.bf16.msra.mxu1 %v2430_v6  ;;  %2266 = vmatprep.mubr.f32.mxu1 %v2723_v52 }
 0x124   :  { %2435 = vmatprep.subr.bf16.mxu1 %v2765_v35 }
 0x126   :  { %2267 = vmatmul.mubr.f32.vlgmr.msra.gmra.mrb[4].mxu1 %v2747_v3 }
 0x127   :  { %2437 = vmatpush3.bf16.msra.mxu1 %v2765_v35  ;;  %2269 = vmatprep.mubr.f32.mxu1 %v2749_v9 }
 0x128   :  { %2439 = vmatprep.subr.bf16.mxu1 %v2398_v51 }
 0x12a   :  { %2270 = vmatmul.mubr.f32.gmra.mrb[6].mxu1 %v2755_v18 }
 0x12b   :  { %2441 = vmatpush3.bf16.msra.mxu1 %v2398_v51  ;;  %2280 = vmatprep.mubr.f32.mxu1 %v2723_v52  ;;  %v1415_v52 = vsub.f32 %v2810_v13, %v1414_v14 }
 0x12e   :  { %2281 = vmatmul.mubr.f32.vlgmr.msra.gmra.mrb[4].mxu1 %v2747_v3  ;;  %v1416_v3 = vand.u32 4294901760, %v1415_v52 }
 0x12f   :  { %2283 = vmatprep.mubr.f32.mxu1 %v2749_v9  ;;  %v2604_v9 = vmov 2  }
 0x130   :  { %2294 = vmatprep.mubr.f32.mxu0 %v1416_v3  ;;  %2572 = vset.pattern.permute.xlu1 %v2604_v9 }
 0x131   :  { %2573 = vset.pattern.permute.xlu0 %v2604_v9  ;;  %1316 = vperm.xlu1 %2572, %v2678_v27  }
 0x132   :  { %2284 = vmatmul.mubr.f32.gmra.mrb[6].mxu1 %v2755_v18  ;;  %1320 = vperm.xlu0 %2573, %v2695_v48   ;;  %v1313_v18 = vld [vmem:[%s2907_s3 + $0x10] sm:$0xff] }
 0x133   :  { %v1338_v19 = vsel %vm680_vm2, %v1313_v18, 0 }
 0x134   :  { %v2838_v21 = vand.u32 4294901760, %v1338_v19 }
 0x135   :  { %1324 = vperm.xlu1 %2572, %v2689_v42  }
 0x136   :  { %2574 = vset.pattern.permute.xlu0 %v2605_v15  ;;  %v2847_v31 = vsub.f32 %v1338_v19, %v2838_v21 }
 0x137   :  { %1962 = vperm.xlu0 %2574, %v2678_v27  }
 0x138   :  { %v1434_v46 = vand.u32 4294901760, %v2847_v31 }
 0x139   :  { %1328 = vperm.xlu1 %2572, %v2702_v49  }
 0x13a   :  { %v1435_v0 = vsub.f32 %v2847_v31, %v1434_v46 }
 0x13b   :  { %1974 = vperm.xlu0 %2574, %v2702_v49   ;;  %v1335_v49 = vsel %vm680_vm2, %v1312_v17, 0 }
 0x13c   :  { %v1436_v52 = vand.u32 4294901760, %v1435_v0 }
 0x13d   :  { %2575 = vset.pattern.permute.xlu1 %v2605_v15 }
 0x13e   :  { %1966 = vperm.xlu1 %2575, %v2695_v48   ;;  %v1314_v48 = vld [vmem:[%s2907_s3 + $0x18] sm:$0xff]  ;;  %s2607_s3 = smov [#allocation2]  }
 0x13f   :  { %2577 = vset.pattern.permute.xlu0 %v2606_v16  ;;  %v1341_v22 = vsel %vm680_vm2, %v1314_v48, 0  ;;  %s2002_s25 = sshll.u32 %s2607_s3, 4  ;;  %s2003_s25 = int_to_ptr.vmem [resolvable:$true] %s2002_s25 }
 0x140   :  { %v2844_v29 = vand.u32 4294901760, %v1341_v22  ;;  %s2578_s26 = scalar_lea.vmem %s2003_s25, 16  ;;  %s2582_s27 = scalar_lea.vmem %s2003_s25, 32 }
 0x141   :  { %p2579_p0 = scmp.ne.s32.totalorder %s2003_s25, %s2578_s26  ;;  %p2583_p1 = scmp.lt.s32.totalorder %s2003_s25, %s2003_s25 }
 0x142   :  { %1970 = vperm.xlu1 %2575, %v2689_v42   ;;  %v2836_v42 = vand.u32 4294901760, %v1335_v49  ;;  %v2851_v43 = vsub.f32 %v1341_v22, %v2844_v29  ;;  %p2584_p2 = scmp.lt.s32.totalorder %s2582_s27, %s2578_s26 }
 0x144   :  { %v2842_v26 = vsub.f32 %v1335_v49, %v2836_v42  ;;  %v1444_v60 = vand.u32 4294901760, %v2851_v43  ;;  %p2585_p3 = por %p2584_p2, %p2583_p1 }
 0x146   :  { %2576 = vset.pattern.permute.xlu1 %v2606_v16  ;;  %v1424_v39 = vand.u32 4294901760, %v2842_v26  ;;  %v1445_v53 = vsub.f32 %v2851_v43, %v1444_v60  ;;  %p2586_p4 = pnand %p2585_p3, %p2579_p0 }
 0x147   :  { %1991 = vperm.xlu1 %2576, %v2678_v27   ;;  %v670_v27 = vpop.permute.xlu1 %669 }
 0x148   :  { %v1425_v57 = vsub.f32 %v2842_v26, %v1424_v39  ;;  %v1446_v18 = vand.u32 4294901760, %v1445_v53 }
 0x14a   :  { %v1426_v7 = vand.u32 4294901760, %v1425_v57 }
 0x14b   :  { %v674_v36 = vpop.permute.xlu1 %673 }
 0x1b1   :  { %v1321_v48 = vpop.permute.xlu0 %1320 }
 0x201   :  { %v2282_v23 = vpop.f32.mrb[4].mxu1 }
 0x202   :  { %v2498_v24 = vadd.f32 %v2282_v23, %v670_v27  ;;  %v1285_v25 = vpop.f32.mrb[5].mxu1 }
 0x203   :  { %v2499_v28 = vadd.f32 %v1285_v25, %v666_v20 }
 0x204   :  { %v1308_v30 = vmax.f32 %v2498_v24, 0.0 }
 0x205   :  { %v1307_v32 = vmax.f32 %v2499_v28, 0.0  ;;  %v2285_v34 = vpop.f32.mrb[6].mxu1  ;;  %v1963_v28 = vpop.permute.xlu0 %1962 }
 0x206   :  { %v1347_v35 = vand.u32 4294901760, %v1308_v30  ;;  %v2500_v37 = vadd.f32 %v2285_v34, %v678_v33  ;;  %v1297_v38 = vpop.f32.mrb[7].mxu1 }
 0x207   :  { %v1344_v40 = vand.u32 4294901760, %v1307_v32  ;;  %v2501_v41 = vadd.f32 %v1297_v38, %v674_v36 }
 0x208   :  { %v1461_v44 = vsub.f32 %v1308_v30, %v1347_v35  ;;  %v1310_v45 = vmax.f32 %v2500_v37, 0.0 }
 0x209   :  { %v2854_v47 = vpack.c.bf16 %v1347_v35, %v1344_v40  ;;  %v1454_v50 = vsub.f32 %v1307_v32, %v1344_v40  ;;  %v1309_v51 = vmax.f32 %v2501_v41, 0.0  ;;  %v1975_v37 = vpop.permute.xlu0 %1974 }
 0x20a   :  { %v1462_v55 = vand.u32 4294901760, %v1461_v44  ;;  %v1353_v56 = vand.u32 4294901760, %v1310_v45 }
 0x20b   :  { %v1455_v58 = vand.u32 4294901760, %v1454_v50  ;;  %v1350_v59 = vand.u32 4294901760, %v1309_v51  ;;  %2443 = vmatprep.subr.bf16.mxu0 %v2854_v47  ;;  %v2458_v61 = vpack.c.bf16 %v1461_v44, %v1454_v50 }
 0x20c   :  { %v1475_v62 = vsub.f32 %v1310_v45, %v1353_v56  ;;  %2445 = vmatpush3.bf16.msra.mxu0 %v2854_v47  ;;  %v1463_v63 = vsub.f32 %v1461_v44, %v1462_v55 }
 0x20d   :  { %v2446_v1 = vpack.c.bf16 %v1353_v56, %v1350_v59  ;;  %v1468_v2 = vsub.f32 %v1309_v51, %v1350_v59  ;;  %v1456_v4 = vsub.f32 %v1454_v50, %v1455_v58  ;;  %v2474_v5 = vpack.c.bf16 %v1462_v55, %v1455_v58 }
 0x20e   :  { %v1476_v6 = vand.u32 4294901760, %v1475_v62  ;;  %v1464_v8 = vand.u32 4294901760, %v1463_v63 }
 0x20f   :  { %v1469_v10 = vand.u32 4294901760, %v1468_v2  ;;  %2447 = vmatprep.subr.bf16.mxu0 %v2446_v1  ;;  %v1457_v11 = vand.u32 4294901760, %v1456_v4  ;;  %v2462_v54 = vpack.c.bf16 %v1475_v62, %v1468_v2 }
 0x210   :  { %2449 = vmatpush3.bf16.msra.mxu0 %v2446_v1  ;;  %v1477_v3 = vsub.f32 %v1475_v62, %v1476_v6 }
 0x211   :  { %v2450_v9 = vpack.c.bf16 %v1464_v8, %v1457_v11  ;;  %v1470_v15 = vsub.f32 %v1468_v2, %v1469_v10  ;;  %v2478_v16 = vpack.c.bf16 %v1476_v6, %v1469_v10 }
 0x212   :  { %v1478_v17 = vand.u32 4294901760, %v1477_v3 }
 0x213   :  { %2295 = vmatmul.mubr.f32.vlgmr.msra.gmra.mrb[4].mxu0 %v1426_v7  ;;  %2451 = vmatprep.subr.bf16.mxu0 %v2450_v9  ;;  %v1471_v49 = vand.u32 4294901760, %v1470_v15 }
 0x214   :  { %2453 = vmatpush3.bf16.msra.mxu0 %v2450_v9  ;;  %2297 = vmatprep.mubr.f32.mxu0 %v1436_v52 }
 0x215   :  { %v2454_v19 = vpack.c.bf16 %v1478_v17, %v1471_v49 }
 0x217   :  { %2298 = vmatmul.mubr.f32.gmra.mrb[6].mxu0 %v1446_v18  ;;  %2455 = vmatprep.subr.bf16.mxu0 %v2454_v19 }
 0x218   :  { %2457 = vmatpush3.bf16.msra.mxu0 %v2454_v19  ;;  %2308 = vmatprep.mubr.f32.mxu0 %v2807_v12 }
 0x219   :  { %2459 = vmatprep.subr.bf16.mxu0 %v2458_v61 }
 0x21b   :  { %2309 = vmatmul.mubr.f32.vlgmr.msra.gmra.mrb[4].mxu0 %v2836_v42 }
 0x21c   :  { %2461 = vmatpush3.bf16.msra.mxu0 %v2458_v61  ;;  %2311 = vmatprep.mubr.f32.mxu0 %v2838_v21 }
 0x21d   :  { %2463 = vmatprep.subr.bf16.mxu0 %v2462_v54 }
 0x21f   :  { %2312 = vmatmul.mubr.f32.gmra.mrb[6].mxu0 %v2844_v29 }
 0x220   :  { %2465 = vmatpush3.bf16.msra.mxu0 %v2462_v54  ;;  %2322 = vmatprep.mubr.f32.mxu0 %v2810_v13  ;;  %v1317_v13 = vpop.permute.xlu1 %1316 }
 0x221   :  { %2467 = vmatprep.subr.bf16.mxu0 %v2854_v47 }
 0x223   :  { %2323 = vmatmul.mubr.f32.vlgmr.msra.gmra.mrb[4].mxu0 %v2842_v26 }
 0x224   :  { %2469 = vmatpush3.bf16.msra.mxu0 %v2854_v47  ;;  %2325 = vmatprep.mubr.f32.mxu0 %v2847_v31 }
 0x225   :  { %2471 = vmatprep.subr.bf16.mxu0 %v2446_v1 }
 0x227   :  { %2326 = vmatmul.mubr.f32.gmra.mrb[6].mxu0 %v2851_v43 }
 0x228   :  { %2473 = vmatpush3.bf16.msra.mxu0 %v2446_v1  ;;  %2336 = vmatprep.mubr.f32.mxu0 %v1414_v14  ;;  %v1325_v14 = vpop.permute.xlu1 %1324 }
 0x229   :  { %2475 = vmatprep.subr.bf16.mxu0 %v2474_v5 }
 0x22b   :  { %2337 = vmatmul.mubr.f32.vlgmr.msra.gmra.mrb[4].mxu0 %v1424_v39 }
 0x22c   :  { %2477 = vmatpush3.bf16.msra.mxu0 %v2474_v5  ;;  %2339 = vmatprep.mubr.f32.mxu0 %v1434_v46  ;;  %v1329_v20 = vpop.permute.xlu1 %1328 }
 0x22d   :  { %2479 = vmatprep.subr.bf16.mxu0 %v2478_v16 }
 0x22f   :  { %2340 = vmatmul.mubr.f32.gmra.mrb[6].mxu0 %v1444_v60 }
 0x230   :  { %2481 = vmatpush3.bf16.msra.mxu0 %v2478_v16  ;;  %2350 = vmatprep.mubr.f32.mxu0 %v2807_v12  ;;  %v1967_v26 = vpop.permute.xlu1 %1966 }
 0x231   :  { %2483 = vmatprep.subr.bf16.mxu0 %v2854_v47 }
 0x233   :  { %2351 = vmatmul.mubr.f32.vlgmr.msra.gmra.mrb[4].mxu0 %v2836_v42 }
 0x234   :  { %2485 = vmatpush3.bf16.msra.mxu0 %v2854_v47  ;;  %2353 = vmatprep.mubr.f32.mxu0 %v2838_v21  ;;  %v1971_v36 = vpop.permute.xlu1 %1970 }
 0x235   :  { %2487 = vmatprep.subr.bf16.mxu0 %v2446_v1 }
 0x237   :  { %2354 = vmatmul.mubr.f32.gmra.mrb[6].mxu0 %v2844_v29 }
 0x238   :  { %2489 = vmatpush3.bf16.msra.mxu0 %v2446_v1  ;;  %2364 = vmatprep.mubr.f32.mxu0 %v2807_v12  ;;  %v1992_v50 = vpop.permute.xlu1 %1991 }
 0x23b   :  { %2365 = vmatmul.mubr.f32.vlgmr.msra.gmra.mrb[4].mxu0 %v2836_v42 }
 0x23c   :  { %2367 = vmatprep.mubr.f32.mxu0 %v2838_v21 }
 0x23f   :  { %2368 = vmatmul.mubr.f32.gmra.mrb[6].mxu0 %v2844_v29 }
 0x30e   :  { %v2366_v27 = vpop.f32.mrb[4].mxu0 }
 0x30f   :  { %v2502_v22 = vadd.f32 %v2366_v27, %v1321_v48  ;;  %v1935_v23 = vpop.f32.mrb[5].mxu0 }
 0x310   :  { %v2503_v24 = vadd.f32 %v1935_v23, %v1317_v13 }
 0x311   :  { %v1958_v25 = vmax.f32 %v2502_v22, 0.0 }
 0x312   :  { %v1957_v30 = vmax.f32 %v2503_v24, 0.0  ;;  %v2369_v31 = vpop.f32.mrb[6].mxu0 }
 0x313   :  { %v1978_v12 = vmul.f32 %v1967_v26, %v1958_v25  ;;  %v2504_v32 = vadd.f32 %v2369_v31, %v1329_v20  ;;  %v1947_v42 = vpop.f32.mrb[7].mxu0 }
 0x314   :  { %v1977_v33 = vmul.f32 %v1963_v28, %v1957_v30  ;;  %v2505_v21 = vadd.f32 %v1947_v42, %v1325_v14 }
 0x315   :  { %v1960_v34 = vmax.f32 %v2504_v32, 0.0 }
 0x316   :  { %v1981_v29 = vadd.f32 %v1978_v12, %v1977_v33  ;;  %v1959_v35 = vmax.f32 %v2505_v21, 0.0 }
 0x317   :  { %v1980_v40 = vmul.f32 %v1975_v37, %v1960_v34 }
 0x318   :  { %v1979_v38 = vmul.f32 %v1971_v36, %v1959_v35 }
 0x31a   :  { %v1982_v39 = vadd.f32 %v1981_v29, %v1979_v38 }
 0x31c   :  { %v1983_v41 = vadd.f32 %v1982_v39, %v1980_v40 }
 0x31e   :  { %v1984_v43 = vrot.slane %v1983_v41, 4 }
 0x320   :  { %v1985_v44 = vadd.f32 %v1984_v43, %v1983_v41 }
 0x322   :  { %v1986_v45 = vrot.slane %v1985_v44, 2 }
 0x324   :  { %v1987_v46 = vadd.f32 %v1986_v45, %v1985_v44 }
 0x326   :  { %v1988_v47 = vrot.slane %v1987_v46, 1 }
 0x328   :  { %v1989_v51 = vadd.f32 %v1988_v47, %v1987_v46 }
 0x32a   :  { %v1994_v55 = vadd.f32 %v1992_v50, %v1989_v51 }
 0x32c   :  { %1995 = vst [vmem:[#allocation2] sm:$0x1] %v1994_v55 }
 0x32d   :  { %2589 = shalt.err (!%p2586_p4)
}
 0x32e   :  { %s2590_s0 = scalar_lea.hbm %s2909_s5, 16 }
 0x32f   :  { %p2591_p5 = scmp.ne.s32.totalorder %s2909_s5, %s2590_s0  ;;  %p2594_p6 = scmp.lt.u32.totalorder %s2590_s0, %s2909_s5 }
 0x331   :  { %p2596_p7 = pnand %p2594_p6, %p2591_p5 }
 0x333   :  { %2599 = shalt.err (!%p2596_p7)
}
 0x334   :  { %2005 = dma.vmem_to_hbm [thread:$0]  %s2003_s25, 16, %s2909_s5, [#allocation3]  }
 0x335   :  { %2600 = dma.done.wait [#allocation3], 16  }
 0x336   :  { %2601 = vsyncadd [#allocation3], 4294967280 }
 0x337   :  { %2009 = vsyncpa [#allocation3], 1 }

</bundles_post_ra>
